<compile_context>
chip_gen: v6e
topology: v6e:2x2x1
jax: 0.10.0
libtpu: 0.0.40
codegen_flags: <defaults>
</compile_context>

<pallas_src>
import functools

import jax
import jax.numpy as jnp
from jax.experimental import pallas as pl
from jax.experimental.pallas import tpu as pltpu


def _round_up(x, m):
    return ((x + m - 1) // m) * m


def _focal_kernel(preds_ref, labels_ref, alpha_ref, out_ref, acc_ref,
                  *, gamma, num_classes, m_valid, tr):
    i = pl.program_id(0)
    nb = pl.num_programs(0)

    @pl.when(i == 0)
    def _():
        acc_ref[...] = jnp.zeros_like(acc_ref)

    # Per-class dense (TR, 128) slabs; C is tiny and static so plain Python
    # loops over classes stay pure VPU elementwise (no XLU reduces, no one-hot).
    xs = [preds_ref[c].astype(jnp.float32) for c in range(num_classes)]
    lab = labels_ref[...].astype(jnp.int32)                   # (TR, 128)

    m = xs[0]
    for c in range(1, num_classes):
        m = jnp.maximum(m, xs[c])
    es = [jnp.exp(xs[c] - m) for c in range(num_classes)]     # EUP
    s = es[0]
    for c in range(1, num_classes):
        s = s + es[c]

    # Gather-by-label via select chains (alpha scalars come from SMEM).
    x_y = xs[0]
    e_y = es[0]
    w = jnp.full_like(m, alpha_ref[0])
    for c in range(1, num_classes):
        sel = lab == c
        x_y = jnp.where(sel, xs[c], x_y)
        e_y = jnp.where(sel, es[c], e_y)
        w = jnp.where(sel, alpha_ref[c], w)

    logp_y = (x_y - m) - jnp.log(s)                           # log-softmax at label
    p_y = e_y / s                                             # softmax prob at label

    # Focal factor: clamp base >= 0; specialize integer gamma to VPU multiplies.
    one_minus = jnp.maximum(1.0 - p_y, 0.0)
    g = float(gamma)
    if g == int(g) and 0 <= int(g) <= 8:
        fw = jnp.ones_like(one_minus)
        for _ in range(int(g)):
            fw = fw * one_minus
    else:
        fw = jnp.power(one_minus, g)

    loss = -(w * fw * logp_y)                                 # (TR, 128)

    # Mask padded / ragged-tail rows with a select (NOT a multiply) so garbage
    # in unfetched tile regions can never leak into the sum.
    r_iota = jax.lax.broadcasted_iota(jnp.int32, (tr, 128), 0)
    l_iota = jax.lax.broadcasted_iota(jnp.int32, (tr, 128), 1)
    row = (i * tr + r_iota) * 128 + l_iota
    loss = jnp.where(row < m_valid, loss, 0.0)

    # Elementwise per-position accumulation; single XLU reduce at the end.
    acc_ref[...] += loss

    @pl.when(i == nb - 1)
    def _():
        out_ref[...] = jnp.full((1, 128), jnp.sum(acc_ref[...]), jnp.float32)


@functools.partial(jax.jit, static_argnames=("gamma",))
def focal_loss_pallas(preds, labels, alpha_vec, gamma=2.0):
    """preds: [..., C] float, labels: [...] int, alpha_vec: [C] float."""
    C = preds.shape[-1]
    preds2 = preds.reshape(-1, C)
    M = preds2.shape[0]

    # Pad rows to a multiple of 32*128 so the repacked row-group axis satisfies
    # f32 (8), bf16 (16) and int8 (32) sublane tiling with one choice of TR.
    M_pad = _round_up(M, 32 * 128)
    R = M_pad // 128                       # 128-row groups (multiple of 32)

    TR = min(2048, R)                      # row-groups per grid step (mult. of 32)
    NB = (R + TR - 1) // TR

    # One repack copy: pad + transpose (class -> leading axis), then a free
    # minor-dim split to [C, R, 128].  Labels repack to [R, 128] int8.
    preds_t = jnp.pad(preds2, ((0, M_pad - M), (0, 0))).T.reshape(C, R, 128)
    labels_r = jnp.pad(labels.reshape(-1).astype(jnp.int8),
                       (0, M_pad - M)).reshape(R, 128)
    alpha_s = alpha_vec.astype(jnp.float32).reshape(C)

    kernel = functools.partial(_focal_kernel, gamma=float(gamma),
                               num_classes=C, m_valid=M, tr=TR)

    cost = pl.CostEstimate(
        flops=30 * M * C,
        transcendentals=M * (C + 2),       # C exps + log + divide per row
        bytes_accessed=M_pad * C * preds.dtype.itemsize + M_pad + 128 * 4)

    out = pl.pallas_call(
        kernel,
        out_shape=jax.ShapeDtypeStruct((1, 128), jnp.float32),
        grid_spec=pltpu.PrefetchScalarGridSpec(
            num_scalar_prefetch=0,
            grid=(NB,),
            in_specs=[
                pl.BlockSpec((C, TR, 128), lambda i: (0, i, 0)),   # preds slabs
                pl.BlockSpec((TR, 128), lambda i: (i, 0)),         # int8 labels
                pl.BlockSpec(memory_space=pltpu.MemorySpace.SMEM), # alpha scalars
            ],
            out_specs=pl.BlockSpec((1, 128), lambda i: (0, 0)),
            scratch_shapes=[pltpu.VMEM((TR, 128), jnp.float32)],
        ),
        compiler_params=pltpu.CompilerParams(
            dimension_semantics=("arbitrary",)),
        cost_estimate=cost,
    )(preds_t, labels_r, alpha_s)

    return out[0, 0] / jnp.float32(M)      # size_average


def focal_loss_ref(preds, labels, alpha_vec, gamma=2.0):
    C = preds.shape[-1]
    x = preds.reshape(-1, C).astype(jnp.float32)
    y = labels.reshape(-1).astype(jnp.int32)
    p = jax.nn.softmax(x, axis=-1)
    logp = jnp.log(p)
    onehot = jax.nn.one_hot(y, C, dtype=jnp.float32)
    p_y = jnp.sum(onehot * p, axis=-1)
    logp_y = jnp.sum(onehot * logp, axis=-1)
    w = alpha_vec[y]
    loss = -w * jnp.power(1.0 - p_y, gamma) * logp_y
    return jnp.sum(loss) / x.shape[0]


if __name__ == "__main__":
    # Module config: alpha=0.25 (scalar) -> [0.25, 0.75, 0.75], gamma=2,
    # num_classes=3, size_average=True.
    num_classes = 3
    gamma = 2.0
    alpha_vec = jnp.concatenate(
        [jnp.array([0.25], jnp.float32),
         jnp.full((num_classes - 1,), 0.75, jnp.float32)])

    # Detection-style inputs: preds [B, N, C], labels [B, N].
    B, N = 2, 8
    key = jax.random.PRNGKey(0)
    kp, kl = jax.random.split(key)
    preds = jax.random.normal(kp, (B, N, num_classes), dtype=jnp.float32)
    labels = jax.random.randint(kl, (B, N), 0, num_classes, dtype=jnp.int32)

    out = focal_loss_pallas(preds, labels, alpha_vec, gamma=gamma)
    out = jax.block_until_ready(out)

    ref = focal_loss_ref(preds, labels, alpha_vec, gamma=gamma)
    assert jnp.allclose(out, ref, rtol=1e-5, atol=1e-5), (out, ref)
    print("KERNEL_OK")
</pallas_src>

<mosaic_0001>
module attributes {stable_mosaic.version = 11 : i64} {
  func.func @_focal_kernel(%arg0: i32, %arg1: memref<3x32x128xf32, #tpu.memory_space<vmem>>, %arg2: memref<32x128xi8, #tpu.memory_space<vmem>>, %arg3: memref<3xf32, #tpu.memory_space<smem>>, %arg4: memref<1x128xf32, #tpu.memory_space<vmem>>, %arg5: memref<32x128xf32, #tpu.memory_space<vmem>>) attributes {dimension_semantics = [#tpu.dimension_semantics<arbitrary>], iteration_bounds = array<i64: 1>, scalar_prefetch = 0 : i64, scratch_operands = 1 : i64, tpu.core_type = #tpu.core_type<tc>, window_params = [{transform_indices = @transform_0, window_bounds = array<i64: 3, 32, 128>}, {transform_indices = @transform_1, window_bounds = array<i64: 32, 128>}, {transform_indices = @transform_2, window_bounds = array<i64: 3>}, {pipeline_mode = #tpu.pipeline_mode<synchronous>, transform_indices = @transform_3, window_bounds = array<i64: 1, 128>}]} {
    %c0_i32 = arith.constant 0 : i32
    %0 = arith.cmpi eq, %arg0, %c0_i32 : i32
    %1 = arith.extui %0 : i1 to i32
    %c0_i32_0 = arith.constant 0 : i32
    %2 = arith.cmpi ne, %1, %c0_i32_0 : i32
    scf.if %2 {
      %cst_22 = arith.constant 0.000000e+00 : f32
      %70 = vector.broadcast %cst_22 : f32 to vector<32x128xf32>
      %c0_23 = arith.constant 0 : index
      %c0_24 = arith.constant 0 : index
      %71 = vector.load %arg5[%c0_23, %c0_24] : memref<32x128xf32, #tpu.memory_space<vmem>>, vector<32x128xf32>
      tpu.vector_store %arg5[%c0_23, %c0_24], %70 {strides = array<i32>} : memref<32x128xf32, #tpu.memory_space<vmem>>, vector<32x128xf32>,
    } else {
    }
    %c0 = arith.constant 0 : index
    %c0_1 = arith.constant 0 : index
    %c0_2 = arith.constant 0 : index
    %3 = vector.load %arg1[%c0, %c0_1, %c0_2] : memref<3x32x128xf32, #tpu.memory_space<vmem>>, vector<1x32x128xf32>
    %4 = vector.shape_cast %3 : vector<1x32x128xf32> to vector<32x128xf32>
    %c1 = arith.constant 1 : index
    %c0_3 = arith.constant 0 : index
    %c0_4 = arith.constant 0 : index
    %5 = vector.load %arg1[%c1, %c0_3, %c0_4] : memref<3x32x128xf32, #tpu.memory_space<vmem>>, vector<1x32x128xf32>
    %6 = vector.shape_cast %5 : vector<1x32x128xf32> to vector<32x128xf32>
    %c2 = arith.constant 2 : index
    %c0_5 = arith.constant 0 : index
    %c0_6 = arith.constant 0 : index
    %7 = vector.load %arg1[%c2, %c0_5, %c0_6] : memref<3x32x128xf32, #tpu.memory_space<vmem>>, vector<1x32x128xf32>
    %8 = vector.shape_cast %7 : vector<1x32x128xf32> to vector<32x128xf32>
    %c0_7 = arith.constant 0 : index
    %c0_8 = arith.constant 0 : index
    %9 = vector.load %arg2[%c0_7, %c0_8] : memref<32x128xi8, #tpu.memory_space<vmem>>, vector<32x128xi8>
    %10 = arith.extsi %9 : vector<32x128xi8> to vector<32x128xi32>
    %11 = arith.maximumf %4, %6 : vector<32x128xf32>
    %12 = arith.maximumf %11, %8 : vector<32x128xf32>
    %13 = arith.subf %4, %12 : vector<32x128xf32>
    %14 = math.exp %13 : vector<32x128xf32>
    %15 = arith.subf %6, %12 : vector<32x128xf32>
    %16 = math.exp %15 : vector<32x128xf32>
    %17 = arith.subf %8, %12 : vector<32x128xf32>
    %18 = math.exp %17 : vector<32x128xf32>
    %19 = arith.addf %14, %16 : vector<32x128xf32>
    %20 = arith.addf %19, %18 : vector<32x128xf32>
    %c0_9 = arith.constant 0 : index
    %21 = memref.load %arg3[%c0_9] : memref<3xf32, #tpu.memory_space<smem>>
    %22 = vector.broadcast %21 : f32 to vector<32x128xf32>
    %c1_i32 = arith.constant 1 : i32
    %23 = vector.broadcast %c1_i32 : i32 to vector<32x128xi32>
    %24 = arith.cmpi eq, %10, %23 : vector<32x128xi32>
    %25 = arith.select %24, %6, %4 : vector<32x128xi1>, vector<32x128xf32>
    %26 = arith.select %24, %16, %14 : vector<32x128xi1>, vector<32x128xf32>
    %c1_10 = arith.constant 1 : index
    %27 = memref.load %arg3[%c1_10] : memref<3xf32, #tpu.memory_space<smem>>
    %28 = vector.broadcast %27 : f32 to vector<32x128xf32>
    %29 = arith.select %24, %28, %22 : vector<32x128xi1>, vector<32x128xf32>
    %c2_i32 = arith.constant 2 : i32
    %30 = vector.broadcast %c2_i32 : i32 to vector<32x128xi32>
    %31 = arith.cmpi eq, %10, %30 : vector<32x128xi32>
    %32 = arith.select %31, %8, %25 : vector<32x128xi1>, vector<32x128xf32>
    %33 = arith.select %31, %18, %26 : vector<32x128xi1>, vector<32x128xf32>
    %c2_11 = arith.constant 2 : index
    %34 = memref.load %arg3[%c2_11] : memref<3xf32, #tpu.memory_space<smem>>
    %35 = vector.broadcast %34 : f32 to vector<32x128xf32>
    %36 = arith.select %31, %35, %29 : vector<32x128xi1>, vector<32x128xf32>
    %37 = arith.subf %32, %12 : vector<32x128xf32>
    %38 = math.log %20 : vector<32x128xf32>
    %39 = arith.subf %37, %38 : vector<32x128xf32>
    %40 = arith.divf %33, %20 : vector<32x128xf32>
    %cst = arith.constant 1.000000e+00 : f32
    %41 = vector.broadcast %cst : f32 to vector<32x128xf32>
    %42 = arith.subf %41, %40 : vector<32x128xf32>
    %cst_12 = arith.constant 0.000000e+00 : f32
    %43 = vector.broadcast %cst_12 : f32 to vector<32x128xf32>
    %44 = arith.maximumf %42, %43 : vector<32x128xf32>
    %cst_13 = arith.constant 1.000000e+00 : f32
    %45 = vector.broadcast %cst_13 : f32 to vector<32x128xf32>
    %46 = arith.mulf %45, %44 : vector<32x128xf32>
    %47 = arith.mulf %46, %44 : vector<32x128xf32>
    %48 = arith.mulf %36, %47 : vector<32x128xf32>
    %49 = arith.mulf %48, %39 : vector<32x128xf32>
    %cst_14 = arith.constant 0.000000e+00 : f32
    %50 = vector.broadcast %cst_14 : f32 to vector<32x128xf32>
    %51 = arith.subf %50, %49 : vector<32x128xf32>
    %52 = tpu.iota {dimensions = array<i32: 0>} : vector<32x128xi32>
    %53 = tpu.iota {dimensions = array<i32: 1>} : vector<32x128xi32>
    %c32_i32 = arith.constant 32 : i32
    %54 = arith.muli %arg0, %c32_i32 : i32
    %55 = vector.broadcast %54 : i32 to vector<32x128xi32>
    %56 = arith.addi %55, %52 : vector<32x128xi32>
    %c128_i32 = arith.constant 128 : i32
    %57 = vector.broadcast %c128_i32 : i32 to vector<32x128xi32>
    %58 = arith.muli %56, %57 : vector<32x128xi32>
    %59 = arith.addi %58, %53 : vector<32x128xi32>
    %c16_i32 = arith.constant 16 : i32
    %60 = vector.broadcast %c16_i32 : i32 to vector<32x128xi32>
    %61 = arith.cmpi slt, %59, %60 : vector<32x128xi32>
    %cst_15 = arith.constant 0.000000e+00 : f32
    %62 = vector.broadcast %cst_15 : f32 to vector<32x128xf32>
    %63 = arith.select %61, %51, %62 : vector<32x128xi1>, vector<32x128xf32>
    %c0_16 = arith.constant 0 : index
    %c0_17 = arith.constant 0 : index
    %64 = vector.load %arg5[%c0_16, %c0_17] : memref<32x128xf32, #tpu.memory_space<vmem>>, vector<32x128xf32>
    %65 = arith.addf %64, %63 : vector<32x128xf32>
    %c0_18 = arith.constant 0 : index
    %c0_19 = arith.constant 0 : index
    %66 = vector.load %arg5[%c0_18, %c0_19] : memref<32x128xf32, #tpu.memory_space<vmem>>, vector<32x128xf32>
    tpu.vector_store %arg5[%c0_18, %c0_19], %65 {strides = array<i32>} : memref<32x128xf32, #tpu.memory_space<vmem>>, vector<32x128xf32>,
    %c0_i32_20 = arith.constant 0 : i32
    %67 = arith.cmpi eq, %arg0, %c0_i32_20 : i32
    %68 = arith.extui %67 : i1 to i32
    %c0_i32_21 = arith.constant 0 : i32
    %69 = arith.cmpi ne, %68, %c0_i32_21 : i32
    scf.if %69 {
      %c0_22 = arith.constant 0 : index
      %c0_23 = arith.constant 0 : index
      %70 = vector.load %arg5[%c0_22, %c0_23] : memref<32x128xf32, #tpu.memory_space<vmem>>, vector<32x128xf32>
      %71 = vector.shape_cast %70 : vector<32x128xf32> to vector<1x32x128xf32>
      %cst_24 = arith.constant dense<0.000000e+00> : vector<1xf32>
      %72 = vector.multi_reduction <add>, %71, %cst_24 [1, 2] : vector<1x32x128xf32> to vector<1xf32>
      %73 = vector.shape_cast %72 : vector<1xf32> to vector<1x1x1xf32>
      %74 = vector.extract %73[0, 0, 0] : f32 from vector<1x1x1xf32>
      %75 = vector.broadcast %74 : f32 to vector<1x128xf32>
      %c0_25 = arith.constant 0 : index
      %c0_26 = arith.constant 0 : index
      %76 = vector.load %arg4[%c0_25, %c0_26] : memref<1x128xf32, #tpu.memory_space<vmem>>, vector<1x128xf32>
      tpu.vector_store %arg4[%c0_25, %c0_26], %75 {strides = array<i32>} : memref<1x128xf32, #tpu.memory_space<vmem>>, vector<1x128xf32>,
    } else {
    }
    return
  }
  func.func @transform_0(%arg0: i32) -> (i32, i32, i32) {
    %c0_i32 = arith.constant 0 : i32
    %c0_i32_0 = arith.constant 0 : i32
    %c0_i32_1 = arith.constant 0 : i32
    return %c0_i32, %arg0, %c0_i32_0 : i32, i32, i32
  }
  func.func @transform_1(%arg0: i32) -> (i32, i32) {
    %c0_i32 = arith.constant 0 : i32
    %c0_i32_0 = arith.constant 0 : i32
    return %arg0, %c0_i32 : i32, i32
  }
  func.func @transform_2(%arg0: i32) -> i32 {
    %c0_i32 = arith.constant 0 : i32
    %c0_i32_0 = arith.constant 0 : i32
    return %c0_i32 : i32
  }
  func.func @transform_3(%arg0: i32) -> (i32, i32) {
    %c0_i32 = arith.constant 0 : i32
    %c0_i32_0 = arith.constant 0 : i32
    %c0_i32_1 = arith.constant 0 : i32
    return %c0_i32, %c0_i32_0 : i32, i32
  }
}

</mosaic_0001>

<bundles_post_ra>
// kernel: focal_loss_pallas.1
= control target key start
LH: loop header
LB: loop body
LE: loop exit
PB: predicated region body
PF: predicated region fallthrough
CT: control target
= control target key end

     0   :  { %8 = vsyncpa [#allocation4], 0  ;;  %s600_s0 = inlined_call_operand.vmem [shape: f32[3,32,128], index: 0, kind: input, shape index: {}]   ;;  %s601_s1 = inlined_call_operand.vmem [shape: s8[32,128], index: 1, kind: input, shape index: {}]   ;;  %s602_s2 = inlined_call_operand.vmem [shape: f32[3], index: 2, kind: input, shape index: {}]   ;;  %s603_s3 = inlined_call_operand.vmem [shape: f32[1,128], index: 3, kind: output, shape index: {}]  }
   0x1   :  { %s19_s14 = sshll.u32 %s602_s2, 4  ;;  %s20_s14 = int_to_ptr.vmem [resolvable:$true] %s19_s14 }
   0x2   :  { %s312_s15 = scalar_lea.vmem %s20_s14, 16  ;;  %p317_p1 = scmp.lt.s32.totalorder %s20_s14, %s20_s14 }
   0x3   :  { %p313_p0 = scmp.ne.s32.totalorder %s20_s14, %s312_s15  ;;  %p318_p2 = scmp.lt.s32.totalorder %s312_s15, %s312_s15 }
   0x5   :  { %p319_p3 = por %p318_p2, %p317_p1 }
   0x7   :  { %p320_p4 = pnand %p319_p3, %p313_p0 }
   0x9   :  { %323 = shalt.err (!%p320_p4)
}
   0xa   :  { %s326_s16 = smov [#allocation3]  }
   0xb   :  { %22 = dma.vmem_to_smem %s20_s14, 16, %s326_s16, [#allocation4]  }
   0xc   :  { %324 = dma.done.wait [#allocation4], 16  }
   0xd   :  { %325 = vsyncadd [#allocation4], 4294967280 }
   0xe   :  { %26 = sfence }
   0xf   :  { %v353_v0 = vld [vmem:[%s600_s0] sm:$0xff]  ;;  %v358_v1 = vld [vmem:[%s600_s0 + $0x8] sm:$0xff]  ;;  %v363_v2 = vld [vmem:[%s600_s0 + $0x10] sm:$0xff]  ;;  %s267_s13 = sld [smem:[#allocation3 + $0x1]] }
  0x10   :  { %v368_v3 = vld [vmem:[%s600_s0 + $0x18] sm:$0xff]  ;;  %v373_v4 = vld [vmem:[%s600_s0 + $0x20] sm:$0xff]  ;;  %v378_v5 = vld [vmem:[%s600_s0 + $0x28] sm:$0xff]  ;;  %s268_s16 = sld [smem:[#allocation3 + $0x2]] }
  0x11   :  { %v383_v6 = vld [vmem:[%s600_s0 + $0x30] sm:$0xff]  ;;  %v388_v7 = vld [vmem:[%s600_s0 + $0x38] sm:$0xff]  ;;  %v393_v8 = vld [vmem:[%s600_s0 + $0x40] sm:$0xff]  ;;  %v54_v9 = vmax.f32 %v353_v0, %v373_v4  ;;  %v55_v10 = vmax.f32 %v358_v1, %v378_v5 }
  0x12   :  { %v402_v11 = vld [vmem:[%s600_s0 + $0x48] sm:$0xff]  ;;  %v407_v12 = vld [vmem:[%s600_s0 + $0x50] sm:$0xff]  ;;  %v412_v13 = vld [vmem:[%s600_s0 + $0x58] sm:$0xff]  ;;  %v56_v14 = vmax.f32 %v363_v2, %v383_v6  ;;  %v57_v15 = vmax.f32 %v368_v3, %v388_v7  ;;  %s106_s0 = sld [smem:[#allocation3]] }
  0x13   :  { %v419_v16 = vmax.f32 %v54_v9, %v393_v8  ;;  %v422_v17 = vmax.f32 %v55_v10, %v402_v11  ;;  %v49_v9 = vld [vmem:[%s601_s1] sm:$0xff]  ;;  %v192_v10 = vlaneseq }
  0x14   :  { %v425_v18 = vmax.f32 %v56_v14, %v407_v12  ;;  %v428_v19 = vmax.f32 %v57_v15, %v412_v13  ;;  %v50_v14 = vunpack.c.0.s8 %v49_v9  ;;  %v51_v15 = vunpack.c.1.s8 %v49_v9 }
  0x15   :  { %v62_v20 = vsub.f32 %v353_v0, %v419_v16  ;;  %v63_v21 = vsub.f32 %v358_v1, %v422_v17  ;;  %v74_v22 = vsub.f32 %v373_v4, %v419_v16  ;;  %v75_v23 = vsub.f32 %v378_v5, %v422_v17 }
  0x16   :  { %v64_v24 = vsub.f32 %v363_v2, %v425_v18  ;;  %v65_v25 = vsub.f32 %v368_v3, %v428_v19  ;;  %v76_v28 = vsub.f32 %v383_v6, %v425_v18  ;;  %v77_v29 = vsub.f32 %v388_v7, %v428_v19 }
  0x17   :  { %v66_v26 = vmul.f32 1.442695, %v62_v20  ;;  %v68_v27 = vmul.f32 1.442695, %v63_v21  ;;  %v86_v30 = vsub.f32 %v393_v8, %v419_v16  ;;  %v78_v33 = vmul.f32 1.442695, %v74_v22 }
  0x18   :  { %v70_v31 = vmul.f32 1.442695, %v64_v24  ;;  %v72_v32 = vmul.f32 1.442695, %v65_v25  ;;  %v80_v34 = vmul.f32 1.442695, %v75_v23  ;;  %v87_v35 = vsub.f32 %v402_v11, %v422_v17 }
  0x19   :  { %272 = vpow2.f32 %v66_v26  ;;  %v82_v36 = vmul.f32 1.442695, %v76_v28  ;;  %v88_v37 = vsub.f32 %v407_v12, %v425_v18  ;;  %v84_v38 = vmul.f32 1.442695, %v77_v29 }
  0x1a   :  { %274 = vpow2.f32 %v68_v27  ;;  %v89_v39 = vsub.f32 %v412_v13, %v428_v19  ;;  %v90_v40 = vmul.f32 1.442695, %v86_v30  ;;  %v92_v41 = vmul.f32 1.442695, %v87_v35 }
  0x1b   :  { %276 = vpow2.f32 %v70_v31  ;;  %v94_v42 = vmul.f32 1.442695, %v88_v37  ;;  %v52_v20 = vunpack.c.2.s8 %v49_v9  ;;  %v484_v21 = vshrl.u32 %v192_v10, 7 }
  0x1c   :  { %278 = vpow2.f32 %v72_v32  ;;  %v96_v43 = vmul.f32 1.442695, %v89_v39  ;;  %v53_v22 = vunpack.c.3.s8 %v49_v9  ;;  %v107_v23 = vstv %s106_s0 }
  0x1d   :  { %280 = vpow2.f32 %v78_v33  ;;  %vm486_vm0 = vcmp.eq.s32.totalorder %v50_v14, 1  ;;  %v121_v25 = vstv %s267_s13  ;;  %v490_v26 = vand.u32 127, %v192_v10 }
  0x1e   :  { %282 = vpow2.f32 %v80_v34  ;;  %vm492_vm1 = vcmp.eq.s32.totalorder %v51_v15, 1  ;;  %vm496_vm2 = vcmp.eq.s32.totalorder %v52_v20, 1  ;;  %v501_v29 = vadd.s32 8, %v484_v21 }
  0x1f   :  { %284 = vpow2.f32 %v82_v36  ;;  %v504_v30 = vadd.s32 16, %v484_v21  ;;  %vm506_vm3 = vcmp.eq.s32.totalorder %v53_v22, 1  ;;  %v112_v32 = vsel %vm486_vm0, %v373_v4, %v353_v0 }
  0x20   :  { %286 = vpow2.f32 %v84_v38  ;;  %v113_v33 = vsel %vm492_vm1, %v378_v5, %v358_v1  ;;  %v114_v34 = vsel %vm496_vm2, %v383_v6, %v363_v2  ;;  %v115_v35 = vsel %vm506_vm3, %v388_v7, %v368_v3 }
  0x21   :  { %288 = vpow2.f32 %v90_v40  ;;  %v122_v4 = vsel %vm486_vm0, %v121_v25, %v107_v23  ;;  %vm532_vm4 = vcmp.eq.s32.totalorder %v50_v14, 2  ;;  %v123_v3 = vsel %vm492_vm1, %v121_v25, %v107_v23 }
  0x22   :  { %290 = vpow2.f32 %v92_v41  ;;  %v124_v6 = vsel %vm496_vm2, %v121_v25, %v107_v23  ;;  %vm544_vm5 = vcmp.eq.s32.totalorder %v51_v15, 2  ;;  %v125_v38 = vsel %vm506_vm3, %v121_v25, %v107_v23 }
  0x23   :  { %292 = vpow2.f32 %v94_v42  ;;  %vm554_vm6 = vcmp.eq.s32.totalorder %v52_v20, 2  ;;  %v139_v40 = vstv %s268_s16  ;;  %vm129_vm7 = vcmp.eq.s32.totalorder %v53_v22, 2 }
  0x24   :  { %294 = vpow2.f32 %v96_v43  ;;  %v130_v43 = vsel %vm532_vm4, %v393_v8, %v112_v32  ;;  %v196_v14 = vadd.s32 24, %v484_v21  ;;  %v207_v27 = vmul.u32 128, %v504_v30 }
  0x26   :  { %v454_v44 = vpop.eup %272  ;;  %v211_v7 = vadd.s32 %v207_v27, %v490_v26 }
  0x27   :  { %v456_v45 = vpop.eup %274 }
  0x28   :  { %v458_v46 = vpop.eup %276  ;;  %vm215_vm10 = vcmp.lt.s32.totalorder %v211_v7, 16 }
  0x29   :  { %v460_v47 = vpop.eup %278 }
  0x2a   :  { %v462_v48 = vpop.eup %280 }
  0x2b   :  { %v464_v49 = vpop.eup %282  ;;  %v98_v50 = vadd.f32 %v462_v48, %v454_v44  ;;  %v116_v0 = vsel %vm486_vm0, %v462_v48, %v454_v44  ;;  %v132_v48 = vsel %vm554_vm6, %v407_v12, %v114_v34 }
  0x2c   :  { %v468_v51 = vpop.eup %284  ;;  %v99_v52 = vadd.f32 %v464_v49, %v456_v45  ;;  %v117_v2 = vsel %vm492_vm1, %v464_v49, %v456_v45  ;;  %v133_v49 = vsel %vm129_vm7, %v412_v13, %v115_v35  ;;  %v143_v13 = vsel %vm129_vm7, %v139_v40, %v125_v38 }
  0x2d   :  { %v472_v53 = vpop.eup %286  ;;  %v100_v54 = vadd.f32 %v468_v51, %v458_v46  ;;  %v118_v37 = vsel %vm496_vm2, %v468_v51, %v458_v46  ;;  %v131_v46 = vsel %vm544_vm5, %v402_v11, %v113_v33  ;;  %v140_v51 = vsel %vm532_vm4, %v139_v40, %v122_v4 }
  0x2e   :  { %v289_v55 = vpop.eup %288  ;;  %v101_v56 = vadd.f32 %v472_v53, %v460_v47  ;;  %v119_v42 = vsel %vm506_vm3, %v472_v53, %v460_v47  ;;  %v142_v11 = vsel %vm554_vm6, %v139_v40, %v124_v6  ;;  %v208_v33 = vmul.u32 128, %v196_v14 }
  0x2f   :  { %v291_v57 = vpop.eup %290  ;;  %v102_v58 = vadd.f32 %v289_v55, %v98_v50  ;;  %v134_v44 = vsel %vm532_vm4, %v289_v55, %v116_v0 }
  0x30   :  { %v293_v59 = vpop.eup %292  ;;  %v103_v60 = vadd.f32 %v291_v57, %v99_v52  ;;  %v135_v47 = vsel %vm544_vm5, %v291_v57, %v117_v2  ;;  %v141_v52 = vsel %vm544_vm5, %v139_v40, %v123_v3  ;;  %v145_v57 = vsub.f32 %v131_v46, %v422_v17 }
  0x31   :  { %v478_v61 = vpop.eup %294  ;;  %v104_v62 = vadd.f32 %v293_v59, %v100_v54  ;;  %296 = vlog2.f32 %v102_v58  ;;  %v136_v8 = vsel %vm554_vm6, %v293_v59, %v118_v37  ;;  %v144_v54 = vsub.f32 %v130_v43, %v419_v16 }
  0x32   :  { %v105_v63 = vadd.f32 %v478_v61, %v101_v56  ;;  %298 = vlog2.f32 %v103_v60  ;;  %v137_v12 = vsel %vm129_vm7, %v478_v61, %v119_v42  ;;  %v147_v59 = vsub.f32 %v133_v49, %v428_v19 }
  0x33   :  { %300 = vlog2.f32 %v104_v62  ;;  %v205_v16 = vmul.u32 128, %v484_v21  ;;  %v206_v17 = vmul.u32 128, %v501_v29  ;;  %v212_v37 = vadd.s32 %v208_v33, %v490_v26 }
  0x34   :  { %302 = vlog2.f32 %v105_v63 }
  0x35   :  { %304 = vrcp.f32 %v102_v58  ;;  %v146_v58 = vsub.f32 %v132_v48, %v425_v18  ;;  %v209_v4 = vadd.s32 %v205_v16, %v490_v26  ;;  %v210_v2 = vadd.s32 %v206_v17, %v490_v26 }
  0x36   :  { %306 = vrcp.f32 %v103_v60  ;;  %vm216_vm11 = vcmp.lt.s32.totalorder %v212_v37, 16 }
  0x37   :  { %308 = vrcp.f32 %v104_v62  ;;  %vm213_vm8 = vcmp.lt.s32.totalorder %v209_v4, 16  ;;  %vm214_vm9 = vcmp.lt.s32.totalorder %v210_v2, 16 }
  0x38   :  { %310 = vrcp.f32 %v105_v63 }
  0x3e   :  { %v297_v5 = vpop.eup %296 }
  0x3f   :  { %v299_v36 = vpop.eup %298  ;;  %v149_v63 = vmul.f32 0.6931472, %v297_v5 }
  0x40   :  { %v301_v41 = vpop.eup %300  ;;  %v151_v15 = vmul.f32 0.6931472, %v299_v36 }
  0x41   :  { %v303_v45 = vpop.eup %302  ;;  %v153_v22 = vmul.f32 0.6931472, %v301_v41  ;;  %v156_v28 = vsub.f32 %v144_v54, %v149_v63 }
  0x42   :  { %v305_v50 = vpop.eup %304  ;;  %v155_v18 = vmul.f32 0.6931472, %v303_v45  ;;  %v157_v34 = vsub.f32 %v145_v57, %v151_v15 }
  0x43   :  { %v307_v53 = vpop.eup %306  ;;  %v161_v55 = vmul.f32 %v305_v50, %v134_v44  ;;  %v158_v21 = vsub.f32 %v146_v58, %v153_v22 }
  0x44   :  { %v309_v56 = vpop.eup %308  ;;  %v163_v60 = vmul.f32 %v307_v53, %v135_v47  ;;  %v159_v29 = vsub.f32 %v147_v59, %v155_v18 }
  0x45   :  { %v311_v62 = vpop.eup %310  ;;  %v165_v9 = vmul.f32 %v309_v56, %v136_v8  ;;  %v168_v10 = vsub.f32 1.0, %v161_v55 }
  0x46   :  { %v167_v61 = vmul.f32 %v311_v62, %v137_v12  ;;  %v169_v20 = vsub.f32 1.0, %v163_v60 }
  0x47   :  { %v170_v23 = vsub.f32 1.0, %v165_v9  ;;  %v172_v24 = vmax.f32 %v168_v10, 0.0 }
  0x48   :  { %v171_v25 = vsub.f32 1.0, %v167_v61  ;;  %v173_v19 = vmax.f32 %v169_v20, 0.0 }
  0x49   :  { %v174_v31 = vmax.f32 %v170_v23, 0.0  ;;  %v176_v32 = vmul.f32 %v172_v24, %v172_v24 }
  0x4a   :  { %v175_v35 = vmax.f32 %v171_v25, 0.0  ;;  %v177_v0 = vmul.f32 %v173_v19, %v173_v19 }
  0x4b   :  { %v178_v1 = vmul.f32 %v174_v31, %v174_v31  ;;  %v180_v5 = vmul.f32 %v176_v32, %v140_v51 }
  0x4c   :  { %v179_v3 = vmul.f32 %v175_v35, %v175_v35  ;;  %v181_v6 = vmul.f32 %v177_v0, %v141_v52 }
  0x4d   :  { %v182_v30 = vmul.f32 %v178_v1, %v142_v11  ;;  %v184_v36 = vmul.f32 %v180_v5, %v156_v28 }
  0x4e   :  { %v183_v38 = vmul.f32 %v179_v3, %v143_v13  ;;  %v185_v39 = vmul.f32 %v181_v6, %v157_v34 }
  0x4f   :  { %v186_v40 = vmul.f32 %v182_v30, %v158_v21  ;;  %v188_v41 = vsub.f32 0.0, %v184_v36 }
  0x50   :  { %v187_v42 = vmul.f32 %v183_v38, %v159_v29  ;;  %v189_v43 = vsub.f32 0.0, %v185_v39 }
  0x51   :  { %v190_v44 = vsub.f32 0.0, %v186_v40  ;;  %v217_v45 = vsel %vm213_vm8, %v188_v41, 0.0 }
  0x52   :  { %v191_v46 = vsub.f32 0.0, %v187_v42  ;;  %v218_v48 = vsel %vm214_vm9, %v189_v43, 0.0 }
  0x53   :  { %v219_v49 = vsel %vm215_vm10, %v190_v44, 0.0  ;;  %v240_v47 = vadd.f32 %v218_v48, %v217_v45 }
  0x54   :  { %v220_v50 = vsel %vm216_vm11, %v191_v46, 0.0 }
  0x55   :  { %v241_v8 = vadd.f32 %v240_v47, %v219_v49 }
  0x57   :  { %v242_v51 = vadd.f32 %v241_v8, %v220_v50 }
  0x59   :  { %243 = vadd.xlane.f32.xlu0 %v242_v51 }
  0xe2   :  { %v244_v26 = vpop.xlane.xlu0 %243 }
  0xe3   :  { %v245_v52 = vrot.slane %v244_v26, 4 }
  0xe5   :  { %v246_v11 = vadd.f32 %v245_v52, %v244_v26 }
  0xe7   :  { %v247_v53 = vrot.slane %v246_v11, 2 }
  0xe9   :  { %v248_v12 = vadd.f32 %v247_v53, %v246_v11 }
  0xeb   :  { %v249_v13 = vrot.slane %v248_v12, 1 }
  0xed   :  { %v250_v54 = vadd.f32 %v249_v13, %v248_v12 }
  0xef   :  { %269 = vpush %v250_v54 }
 0x120   :  { %s270_s1 = spop %269 }
 0x121   :  { %v252_v55 = vstv %s270_s1 }
 0x122   :  { %253 = vst [vmem:[%s603_s3] sm:$0x1] %v252_v55 }
 0x123   :  { %258 = vsyncpa [#allocation4], 1 }

</bundles_post_ra>
